<compile_context>
chip_gen: v7x
topology: tpu7x:2x2x1
jax: 0.10.0
libtpu: 0.0.40
codegen_flags: <defaults>
</compile_context>

<pallas_src>
import math

import jax
import jax.numpy as jnp
import numpy as np
from jax.experimental import pallas as pl
from jax.experimental.pallas import tpu as pltpu

LANE = 128      # vreg lane width (last dim)
SUBLANE = 8     # vreg sublane width (second-to-last dim)


def _round_up(x, m):
    return ((x + m - 1) // m) * m


# ------------------------------- Pallas kernel ------------------------------- #
def _make_fused_mlp_kernel(n_layers):
    """Returns kernel(x_ref, w_0, b_0, ..., w_{L-1}, b_{L-1}, o_ref)."""

    def kernel(x_ref, *refs):
        o_ref = refs[2 * n_layers]
        h = x_ref[...]                                    # (TILE_N, F) f32 row tile
        for i in range(n_layers):
            w = refs[2 * i][...]                          # (in_pad, out_pad), VMEM-resident
            b = refs[2 * i + 1][...]                      # (1, out_pad)
            # MXU matmul with f32 accumulation; bias add + ReLU fused in the epilogue.
            h = jnp.maximum(
                jnp.dot(h, w, preferred_element_type=jnp.float32) + b, 0.0)
        o_ref[...] = h.astype(o_ref.dtype)

    return kernel


def fused_mlp(x, layers, *, tile_n=4096):
    """x: (N, F) f32; layers: [(w_pad (in,out), b_pad (1,out)), ...] -> (N, out_pad_last)."""
    n, f = x.shape
    n_layers = len(layers)
    out_pad = layers[-1][0].shape[1]

    tile_n = max(SUBLANE, min(tile_n, _round_up(n, SUBLANE)))
    grid = (pl.cdiv(n, tile_n),)

    in_specs = [pl.BlockSpec((tile_n, f), lambda i: (i, 0))]       # row-tiled x
    flat = [x]
    for w, b in layers:
        in_specs.append(pl.BlockSpec(w.shape, lambda i: (0, 0)))   # resident weight
        in_specs.append(pl.BlockSpec(b.shape, lambda i: (0, 0)))   # resident bias
        flat += [w, b]

    return pl.pallas_call(
        _make_fused_mlp_kernel(n_layers),
        out_shape=jax.ShapeDtypeStruct((n, out_pad), jnp.float32),
        grid=grid,
        in_specs=in_specs,
        out_specs=pl.BlockSpec((tile_n, out_pad), lambda i: (i, 0)),
        compiler_params=pltpu.CompilerParams(
            dimension_semantics=("parallel",)),    # megacore split of the row grid (v7x)
    )(*flat)


# ---------------------------- Parameter construction -------------------------- #
def make_layer_sizes(emb_dim, feat_dim, n_layers):
    spread = [min(emb_dim, feat_dim) + int(abs(feat_dim - emb_dim)) * i
              for i in range(n_layers - 1)]
    return [feat_dim] + spread + [emb_dim]


def xavier_uniform(key, fan_out, fan_in):
    # matches torch.nn.init.xavier_uniform_ on a (out, in) weight
    bound = math.sqrt(6.0 / (fan_in + fan_out))
    return jax.random.uniform(key, (fan_out, fan_in), jnp.float32, -bound, bound)


def init_generic_edge_encoder(key, emb_dim, feat_dim, n_layers=1):
    """PyTorch-layout params: list of (w (out, in), b (out,))."""
    sizes = make_layer_sizes(emb_dim, feat_dim, n_layers)
    raw = []
    for i in range(n_layers):
        key, wkey = jax.random.split(key)
        w = xavier_uniform(wkey, sizes[i + 1], sizes[i])
        b = jnp.zeros((sizes[i + 1],), jnp.float32)                # bias filled with 0.0
        raw.append((w, b))
    return raw


def pack_params(raw, feat_dim):
    """One-time preprocessing (NOT per forward): transpose weights to (in, out) and
    zero-pad every layer's output width to a 128-lane multiple so all in-kernel matmuls
    and stores are lane-dense. Zero padding keeps the math exactly equal."""
    layers = []
    prev_out_pad = feat_dim                                        # x itself is not padded
    emb_dim = raw[-1][0].shape[0]
    for w, b in raw:
        out_f, in_f = w.shape
        out_pad = _round_up(out_f, LANE)
        w_pad = jnp.zeros((prev_out_pad, out_pad), jnp.float32)
        w_pad = w_pad.at[:in_f, :out_f].set(jnp.transpose(w))
        b_pad = jnp.zeros((1, out_pad), jnp.float32).at[0, :out_f].set(b)
        layers.append((w_pad, b_pad))
        prev_out_pad = out_pad
    return {"layers": layers, "emb_dim": emb_dim}


# ----------------------------------- Forward ---------------------------------- #
def generic_edge_encoder_forward(packed, x, *, tile_n=4096):
    """Equivalent of GenericEdgeEncoder.forward: fused MLP, ReLU after every Linear."""
    h = x.astype(jnp.float32)                                      # x.float()
    y = fused_mlp(h, packed["layers"], tile_n=tile_n)
    emb_dim = packed["emb_dim"]
    if y.shape[1] != emb_dim:                                      # drop lane padding once
        y = y[:, :emb_dim]
    return y


# ---------------------------------- Reference ---------------------------------- #
def _reference(raw, x):
    h = x.astype(jnp.float32)
    for w, b in raw:
        h = jnp.maximum(h @ w.T + b, 0.0)
    return h


# ------------------------------------- Main ------------------------------------ #
if __name__ == "__main__":
    feat_dim = 32
    emb_dim = 64
    n_layers = 2              # layer_sizes = [32, 32, 64]

    key = jax.random.PRNGKey(0)
    key, pkey = jax.random.split(key)
    raw = init_generic_edge_encoder(pkey, emb_dim, feat_dim, n_layers)
    packed = pack_params(raw, feat_dim)

    # Test 1: small batch, single grid step.
    key, xkey = jax.random.split(key)
    x_small = jax.random.normal(xkey, (16, feat_dim), dtype=jnp.float32)
    out_small = jax.block_until_ready(generic_edge_encoder_forward(packed, x_small))
    assert out_small.shape == (16, emb_dim)
    np.testing.assert_allclose(np.asarray(out_small),
                               np.asarray(_reference(raw, x_small)),
                               rtol=1e-4, atol=1e-4)

    # Test 2: multi-step row grid with a ragged last tile (exercises the pipeline).
    key, xkey = jax.random.split(key)
    x_big = jax.random.normal(xkey, (400, feat_dim), dtype=jnp.float32)
    out_big = jax.block_until_ready(
        generic_edge_encoder_forward(packed, x_big, tile_n=128))
    assert out_big.shape == (400, emb_dim)
    np.testing.assert_allclose(np.asarray(out_big),
                               np.asarray(_reference(raw, x_big)),
                               rtol=1e-4, atol=1e-4)

    print("KERNEL_OK")
</pallas_src>

<mosaic_0001>
module attributes {stable_mosaic.version = 11 : i64} {
  func.func @kernel(%arg0: i32, %arg1: memref<16x32xf32, #tpu.memory_space<vmem>>, %arg2: memref<32x128xf32, #tpu.memory_space<vmem>>, %arg3: memref<1x128xf32, #tpu.memory_space<vmem>>, %arg4: memref<128x128xf32, #tpu.memory_space<vmem>>, %arg5: memref<1x128xf32, #tpu.memory_space<vmem>>, %arg6: memref<16x128xf32, #tpu.memory_space<vmem>>) attributes {dimension_semantics = [#tpu.dimension_semantics<parallel>], iteration_bounds = array<i64: 1>, scalar_prefetch = 0 : i64, scratch_operands = 0 : i64, tpu.core_type = #tpu.core_type<tc>, window_params = [{transform_indices = @transform_0, window_bounds = array<i64: 16, 32>}, {pipeline_mode = #tpu.pipeline_mode<synchronous>, transform_indices = @transform_1, window_bounds = array<i64: 32, 128>}, {pipeline_mode = #tpu.pipeline_mode<synchronous>, transform_indices = @transform_2, window_bounds = array<i64: 1, 128>}, {pipeline_mode = #tpu.pipeline_mode<synchronous>, transform_indices = @transform_3, window_bounds = array<i64: 128, 128>}, {pipeline_mode = #tpu.pipeline_mode<synchronous>, transform_indices = @transform_4, window_bounds = array<i64: 1, 128>}, {transform_indices = @transform_5, window_bounds = array<i64: 16, 128>}]} {
    %c0 = arith.constant 0 : index
    %c0_0 = arith.constant 0 : index
    %0 = vector.load %arg1[%c0, %c0_0] : memref<16x32xf32, #tpu.memory_space<vmem>>, vector<16x32xf32>
    %c0_1 = arith.constant 0 : index
    %c0_2 = arith.constant 0 : index
    %1 = vector.load %arg2[%c0_1, %c0_2] : memref<32x128xf32, #tpu.memory_space<vmem>>, vector<32x128xf32>
    %c0_3 = arith.constant 0 : index
    %c0_4 = arith.constant 0 : index
    %2 = vector.load %arg3[%c0_3, %c0_4] : memref<1x128xf32, #tpu.memory_space<vmem>>, vector<1x128xf32>
    %cst = arith.constant dense<0.000000e+00> : vector<16x128xf32>
    %3 = tpu.matmul %0, %1, %cst {dimension_numbers = #tpu.dot_dimension_numbers<[1], [0], [0], [1], [0, 0, 1, 1], [], []>} : vector<16x32xf32>, vector<32x128xf32>, vector<16x128xf32> -> vector<16x128xf32>
    %4 = vector.broadcast %2 : vector<1x128xf32> to vector<16x128xf32>
    %5 = arith.addf %3, %4 : vector<16x128xf32>
    %cst_5 = arith.constant 0.000000e+00 : f32
    %6 = vector.broadcast %cst_5 : f32 to vector<16x128xf32>
    %7 = arith.maximumf %5, %6 : vector<16x128xf32>
    %c0_6 = arith.constant 0 : index
    %c0_7 = arith.constant 0 : index
    %8 = vector.load %arg4[%c0_6, %c0_7] : memref<128x128xf32, #tpu.memory_space<vmem>>, vector<128x128xf32>
    %c0_8 = arith.constant 0 : index
    %c0_9 = arith.constant 0 : index
    %9 = vector.load %arg5[%c0_8, %c0_9] : memref<1x128xf32, #tpu.memory_space<vmem>>, vector<1x128xf32>
    %cst_10 = arith.constant dense<0.000000e+00> : vector<16x128xf32>
    %10 = tpu.matmul %7, %8, %cst_10 {dimension_numbers = #tpu.dot_dimension_numbers<[1], [0], [0], [1], [0, 0, 1, 1], [], []>} : vector<16x128xf32>, vector<128x128xf32>, vector<16x128xf32> -> vector<16x128xf32>
    %11 = vector.broadcast %9 : vector<1x128xf32> to vector<16x128xf32>
    %12 = arith.addf %10, %11 : vector<16x128xf32>
    %cst_11 = arith.constant 0.000000e+00 : f32
    %13 = vector.broadcast %cst_11 : f32 to vector<16x128xf32>
    %14 = arith.maximumf %12, %13 : vector<16x128xf32>
    %c0_12 = arith.constant 0 : index
    %c0_13 = arith.constant 0 : index
    %15 = vector.load %arg6[%c0_12, %c0_13] : memref<16x128xf32, #tpu.memory_space<vmem>>, vector<16x128xf32>
    tpu.vector_store %arg6[%c0_12, %c0_13], %14 {strides = array<i32>} : memref<16x128xf32, #tpu.memory_space<vmem>>, vector<16x128xf32>,
    return
  }
  func.func @transform_0(%arg0: i32) -> (i32, i32) {
    %c0_i32 = arith.constant 0 : i32
    %c0_i32_0 = arith.constant 0 : i32
    return %arg0, %c0_i32 : i32, i32
  }
  func.func @transform_1(%arg0: i32) -> (i32, i32) {
    %c0_i32 = arith.constant 0 : i32
    %c0_i32_0 = arith.constant 0 : i32
    %c0_i32_1 = arith.constant 0 : i32
    return %c0_i32, %c0_i32_0 : i32, i32
  }
  func.func @transform_2(%arg0: i32) -> (i32, i32) {
    %c0_i32 = arith.constant 0 : i32
    %c0_i32_0 = arith.constant 0 : i32
    %c0_i32_1 = arith.constant 0 : i32
    return %c0_i32, %c0_i32_0 : i32, i32
  }
  func.func @transform_3(%arg0: i32) -> (i32, i32) {
    %c0_i32 = arith.constant 0 : i32
    %c0_i32_0 = arith.constant 0 : i32
    %c0_i32_1 = arith.constant 0 : i32
    return %c0_i32, %c0_i32_0 : i32, i32
  }
  func.func @transform_4(%arg0: i32) -> (i32, i32) {
    %c0_i32 = arith.constant 0 : i32
    %c0_i32_0 = arith.constant 0 : i32
    %c0_i32_1 = arith.constant 0 : i32
    return %c0_i32, %c0_i32_0 : i32, i32
  }
  func.func @transform_5(%arg0: i32) -> (i32, i32) {
    %c0_i32 = arith.constant 0 : i32
    %c0_i32_0 = arith.constant 0 : i32
    return %arg0, %c0_i32 : i32, i32
  }
}

</mosaic_0001>

<bundles_post_ra>
// kernel: tpu_custom_call.1
= control target key start
LH: loop header
LB: loop body
LE: loop exit
PB: predicated region body
PF: predicated region fallthrough
CT: control target
= control target key end

     0   :  { %10 = vsyncpa [#allocation3], 0  ;;  %s604_s0 = inlined_call_operand.hbm [shape: f32[16,32], index: 0, kind: input, shape index: {}]   ;;  %s605_s1 = inlined_call_operand.hbm [shape: f32[32,128], index: 1, kind: input, shape index: {}]   ;;  %s606_s2 = inlined_call_operand.vmem [shape: f32[1,128], index: 2, kind: input, shape index: {}]   ;;  %s607_s3 = inlined_call_operand.hbm [shape: f32[128,128], index: 3, kind: input, shape index: {}]   ;;  %s608_s4 = inlined_call_operand.vmem [shape: f32[1,128], index: 4, kind: input, shape index: {}]   ;;  %s609_s5 = inlined_call_operand.hbm [shape: f32[16,128], index: 5, kind: output, shape index: {}]  }
   0x1   :  { %11 = vsyncpa [#allocation6], 0 }
   0x2   :  { %12 = vsyncpa [#allocation4], 0  ;;  %s493_s18 = smov [#allocation5]   ;;  %s494_s20 = smov [#allocation2]  }
   0x3   :  { %s30_s19 = sshll.u32 %s493_s18, 4  ;;  %s18_s21 = sshll.u32 %s494_s20, 4  ;;  %s31_s19 = int_to_ptr.vmem [resolvable:$true] %s30_s19  ;;  %s529_s21 = int_to_ptr.vmem [resolvable:$true] %s18_s21 }
   0x4   :  { %s399_s24 = scalar_lea.hbm %s605_s1, 512 }
   0x5   :  { %p400_p0 = scmp.ne.s32.totalorder %s605_s1, %s399_s24  ;;  %p403_p1 = scmp.lt.u32.totalorder %s399_s24, %s605_s1 }
   0x7   :  { %p405_p2 = pnand %p403_p1, %p400_p0 }
   0x9   :  { %408 = shalt.err (!%p405_p2)
}
   0xa   :  { %s409_s29 = scalar_lea.vmem %s31_s19, 512  ;;  %p414_p4 = scmp.lt.s32.totalorder %s31_s19, %s31_s19 }
   0xb   :  { %p410_p3 = scmp.ne.s32.totalorder %s31_s19, %s409_s29  ;;  %p415_p5 = scmp.lt.s32.totalorder %s409_s29, %s409_s29 }
   0xd   :  { %p416_p6 = por %p415_p5, %p414_p4 }
   0xf   :  { %p417_p7 = pnand %p416_p6, %p410_p3 }
  0x11   :  { %420 = shalt.err (!%p417_p7)
}
  0x12   :  { %s495_s30 = smov 128   ;;  %s496_s6 = smov 8  }
  0x13   :  { %36 = dma.hbm_to_vmem [thread:$0]  %s605_s1, 512, %s31_s19, [#allocation6], %s495_s30, %s495_s30, %s496_s6  }
  0x14   :  { %s421_s11 = scalar_lea.hbm %s604_s0, 256 }
  0x15   :  { %p422_p8 = scmp.ne.s32.totalorder %s604_s0, %s421_s11  ;;  %p425_p9 = scmp.lt.u32.totalorder %s421_s11, %s604_s0 }
  0x17   :  { %p427_p10 = pnand %p425_p9, %p422_p8 }
  0x19   :  { %430 = shalt.err (!%p427_p10)
}
  0x1a   :  { %s431_s16 = scalar_lea.vmem %s529_s21, 256  ;;  %p436_p12 = scmp.lt.s32.totalorder %s529_s21, %s529_s21 }
  0x1b   :  { %p432_p11 = scmp.ne.s32.totalorder %s529_s21, %s431_s16  ;;  %p437_p13 = scmp.lt.s32.totalorder %s431_s16, %s431_s16 }
  0x1d   :  { %p438_p0 = por %p437_p13, %p436_p12 }
  0x1f   :  { %p439_p1 = pnand %p438_p0, %p432_p11 }
  0x21   :  { %442 = shalt.err (!%p439_p1)
}
  0x22   :  { %24 = dma.hbm_to_vmem [thread:$0]  %s604_s0, 256, %s529_s21, [#allocation3], %s495_s30, %s495_s30, %s496_s6  }
  0x23   :  { %s497_s18 = smov [#allocation7]   ;;  %s443_s23 = scalar_lea.hbm %s607_s3, 2048 }
  0x24   :  { %s44_s19 = sshll.u32 %s497_s18, 4  ;;  %p444_p2 = scmp.ne.s32.totalorder %s607_s3, %s443_s23  ;;  %s45_s19 = int_to_ptr.vmem [resolvable:$true] %s44_s19 }
  0x25   :  { %p447_p3 = scmp.lt.u32.totalorder %s443_s23, %s607_s3 }
  0x27   :  { %p449_p4 = pnand %p447_p3, %p444_p2 }
  0x29   :  { %452 = shalt.err (!%p449_p4)
}
  0x2a   :  { %s453_s28 = scalar_lea.vmem %s45_s19, 2048  ;;  %p458_p6 = scmp.lt.s32.totalorder %s45_s19, %s45_s19 }
  0x2b   :  { %p454_p5 = scmp.ne.s32.totalorder %s45_s19, %s453_s28  ;;  %p459_p7 = scmp.lt.s32.totalorder %s453_s28, %s453_s28 }
  0x2d   :  { %p460_p8 = por %p459_p7, %p458_p6 }
  0x2f   :  { %p461_p9 = pnand %p460_p8, %p454_p5 }
  0x31   :  { %464 = shalt.err (!%p461_p9)
}
  0x32   :  { %50 = dma.hbm_to_vmem [thread:$0]  %s607_s3, 2048, %s45_s19, [#allocation6], %s495_s30, %s495_s30, %s496_s6  }
  0x33   :  { %487 = dma.done.wait [#allocation3], 256  }
  0x34   :  { %488 = vsyncadd [#allocation3], 4294967040 }
  0x35   :  { %489 = dma.done.wait [#allocation6], 2560  }
  0x36   :  { %490 = vsyncadd [#allocation6], 4294964736  ;;  %vm75_vm0 = vcmask 261120   ;;  %v64_v0 = vld [vmem:[#allocation5] sm:$0xff]  ;;  %v65_v1 = vld [vmem:[#allocation5 + $0x8] sm:$0xff]  ;;  %s498_s9 = smov [#allocation8]  }
  0x37   :  { %v66_v2 = vld [vmem:[#allocation5 + $0x10] sm:$0xff]  ;;  %v353_v3 = vpack.c.bf16 %v65_v1, %v64_v0  ;;  %v67_v4 = vld [vmem:[#allocation5 + $0x18] sm:$0xff]  ;;  %v159_v7 = vld [vmem:[#allocation7] sm:$0xff]  ;;  %s266_s10 = sshll.u32 %s498_s9, 4  ;;  %s267_s10 = int_to_ptr.vmem [resolvable:$true] %s266_s10 }
  0x38   :  { %v62_v5 = vld [vmem:[#allocation2] sm:$0xff]  ;;  %v357_v6 = vpack.c.bf16 %v67_v4, %v66_v2  ;;  %v160_v8 = vld [vmem:[#allocation7 + $0x8] sm:$0xff]  ;;  %v162_v11 = vld [vmem:[#allocation7 + $0x18] sm:$0xff]  ;;  %p470_p11 = scmp.lt.s32.totalorder %s267_s10, %s267_s10 }
  0x39   :  { %315 = vmatprep.mubr.msk.f32.mxu0 %vm75_vm0, %v62_v5  ;;  %v161_v9 = vld [vmem:[#allocation7 + $0x10] sm:$0xff]  ;;  %354 = vmatprep.subr.bf16.mxu0 %v353_v3  ;;  %v361_v10 = vpack.c.bf16 %v160_v8, %v159_v7  ;;  %v163_v13 = vld [vmem:[#allocation7 + $0x20] sm:$0xff]  ;;  %v164_v14 = vld [vmem:[#allocation7 + $0x28] sm:$0xff] }
  0x3a   :  { %356 = vmatpush3.bf16.msra.mxu0 %v353_v3  ;;  %v365_v12 = vpack.c.bf16 %v162_v11, %v161_v9  ;;  %v369_v15 = vpack.c.bf16 %v164_v14, %v163_v13  ;;  %v63_v16 = vld [vmem:[#allocation2 + $0x8] sm:$0xff]  ;;  %v165_v17 = vld [vmem:[#allocation7 + $0x30] sm:$0xff]  ;;  %v167_v20 = vld [vmem:[#allocation7 + $0x40] sm:$0xff] }
  0x3b   :  { %358 = vmatprep.subr.bf16.mxu0 %v357_v6  ;;  %362 = vmatprep.subr.bf16.mxu1 %v361_v10  ;;  %v166_v18 = vld [vmem:[#allocation7 + $0x38] sm:$0xff]  ;;  %v168_v21 = vld [vmem:[#allocation7 + $0x48] sm:$0xff]  ;;  %v169_v23 = vld [vmem:[#allocation7 + $0x50] sm:$0xff] }
  0x3c   :  { %364 = vmatpush3.bf16.msra.mxu1 %v361_v10  ;;  %v373_v19 = vpack.c.bf16 %v166_v18, %v165_v17  ;;  %v377_v22 = vpack.c.bf16 %v168_v21, %v167_v20  ;;  %v170_v24 = vld [vmem:[#allocation7 + $0x58] sm:$0xff]  ;;  %v171_v26 = vld [vmem:[#allocation7 + $0x60] sm:$0xff]  ;;  %v172_v27 = vld [vmem:[#allocation7 + $0x68] sm:$0xff] }
  0x3d   :  { %366 = vmatprep.subr.bf16.mxu1 %v365_v12  ;;  %v381_v25 = vpack.c.bf16 %v170_v24, %v169_v23  ;;  %v385_v28 = vpack.c.bf16 %v172_v27, %v171_v26  ;;  %v173_v29 = vld [vmem:[#allocation7 + $0x70] sm:$0xff]  ;;  %v174_v30 = vld [vmem:[#allocation7 + $0x78] sm:$0xff] }
  0x3e   :  { %360 = vmatpush3.bf16.msra.mxu0 %v357_v6  ;;  %v389_v31 = vpack.c.bf16 %v174_v30, %v173_v29  ;;  %v279_v32 = vld [vmem:[%s606_s2] ss:$0 sm:$0xff]  ;;  %s465_s2 = scalar_lea.vmem %s267_s10, 256 }
  0x3f   :  { %v282_v39 = vld [vmem:[%s608_s4] ss:$0 sm:$0xff]  ;;  %p466_p10 = scmp.ne.s32.totalorder %s267_s10, %s465_s2  ;;  %p471_p12 = scmp.lt.s32.totalorder %s465_s2, %s465_s2 }
  0x40   :  { %368 = vmatpush3.bf16.msra.mxu1 %v365_v12 }
  0x41   :  { %316 = vmatmul.mubr.msk.f32.vlgmr.msra.gmra.mrb[0].mxu0 %vm75_vm0, %v63_v16  ;;  %370 = vmatprep.subr.bf16.mxu1 %v369_v15  ;;  %p472_p13 = por %p471_p12, %p470_p11 }
  0x43   :  { %p473_p0 = pnand %p472_p13, %p466_p10 }
  0x44   :  { %372 = vmatpush3.bf16.msra.mxu1 %v369_v15 }
  0x45   :  { %374 = vmatprep.subr.bf16.mxu1 %v373_v19 }
  0x48   :  { %376 = vmatpush3.bf16.msra.mxu1 %v373_v19 }
  0x49   :  { %378 = vmatprep.subr.bf16.mxu1 %v377_v22 }
  0x4c   :  { %380 = vmatpush3.bf16.msra.mxu1 %v377_v22 }
  0x4d   :  { %382 = vmatprep.subr.bf16.mxu1 %v381_v25 }
  0x50   :  { %384 = vmatpush3.bf16.msra.mxu1 %v381_v25 }
  0x51   :  { %386 = vmatprep.subr.bf16.mxu1 %v385_v28 }
  0x54   :  { %388 = vmatpush3.bf16.msra.mxu1 %v385_v28 }
  0x55   :  { %390 = vmatprep.subr.bf16.mxu1 %v389_v31 }
  0x58   :  { %392 = vmatpush3.bf16.msra.mxu1 %v389_v31 }
 0x114   :  { %v317_v33 = vpop.f32.mrb[0].mxu0 }
 0x115   :  { %v154_v34 = vadd.f32 %v317_v33, %v279_v32  ;;  %v148_v35 = vpop.f32.mrb[1].mxu0 }
 0x116   :  { %v149_v36 = vadd.f32 %v279_v32, %v148_v35 }
 0x117   :  { %v158_v38 = vmax.f32 %v154_v34, 0.0 }
 0x118   :  { %v157_v37 = vmax.f32 %v149_v36, 0.0 }
 0x11a   :  { %350 = vmatprep.mubr.f32.mxu1 %v157_v37 }
 0x11b   :  { %351 = vmatmul.mubr.f32.vlgmr.msra.gmra.mrb[0].mxu1 %v158_v38 }
 0x1ee   :  { %v352_v40 = vpop.f32.mrb[0].mxu1 }
 0x1ef   :  { %v254_v41 = vadd.f32 %v352_v40, %v282_v39  ;;  %v248_v42 = vpop.f32.mrb[1].mxu1 }
 0x1f0   :  { %v249_v43 = vadd.f32 %v282_v39, %v248_v42 }
 0x1f1   :  { %v258_v44 = vmax.f32 %v254_v41, 0.0 }
 0x1f2   :  { %v257_v45 = vmax.f32 %v249_v43, 0.0 }
 0x1f3   :  { %260 = vst [vmem:[#allocation8 + $0x8] sm:$0xff] %v258_v44 }
 0x1f4   :  { %259 = vst [vmem:[#allocation8] sm:$0xff] %v257_v45 }
 0x1f5   :  { %476 = shalt.err (!%p473_p0)
}
 0x1f6   :  { %s477_s12 = scalar_lea.hbm %s609_s5, 256 }
 0x1f7   :  { %p478_p1 = scmp.ne.s32.totalorder %s609_s5, %s477_s12  ;;  %p481_p2 = scmp.lt.u32.totalorder %s477_s12, %s609_s5 }
 0x1f9   :  { %p483_p3 = pnand %p481_p2, %p478_p1 }
 0x1fb   :  { %486 = shalt.err (!%p483_p3)
}
 0x1fc   :  { %272 = dma.vmem_to_hbm [thread:$0]  %s267_s10, 256, %s609_s5, [#allocation4], %s495_s30, %s495_s30, %s496_s6  }
 0x1fd   :  { %491 = dma.done.wait [#allocation4], 256  }
 0x1fe   :  { %492 = vsyncadd [#allocation4], 4294967040 }
 0x1ff   :  { %276 = vsyncpa [#allocation3], 1 }
 0x200   :  { %277 = vsyncpa [#allocation6], 1 }
 0x201   :  { %278 = vsyncpa [#allocation4], 1 }

</bundles_post_ra>
